<compile_context>
chip_gen: v7x
topology: tpu7x:2x2x1
jax: 0.10.0
libtpu: 0.0.40
codegen_flags: <defaults>
</compile_context>

<pallas_src>
import functools

import jax
import jax.numpy as jnp
from jax import lax
from jax.experimental import pallas as pl
from jax.experimental.pallas import tpu as pltpu

EPS = 1e-5  # PyTorch InstanceNorm2d default eps (affine=False, biased variance)


def _round_up(x, m):
    return (x + m - 1) // m * m


def _unet_up_kernel(x_ref, w_ref, mask_ref, out_ref, *, H, W, TCin, KT):
    """One (n, cout-tile, cin-tile) grid step of ConvTranspose2d + InstanceNorm + ReLU.

    x_ref:    (TCin, Lp)          bf16  zero-padded input, rows flattened with pitch W+2
    w_ref:    (4, 4, TCout, Cin)  bf16  per-(phase, tap) weights, resident across k
    mask_ref: (1, Pq)             f32   1.0 on valid output lanes, 0.0 on pad lanes
    out_ref:  (4, TCout, Pq)      f32   output block (doubles as the fp32 accumulator)
    """
    Wp = W + 2
    Pq = out_ref.shape[-1]
    k = pl.program_id(2)

    xall = x_ref[...]                                     # (TCin, Lp) bf16

    if KT > 1:
        koff = pl.multiple_of(k * TCin, TCin)             # TCin is a 128-multiple here

    # Sub-pixel decomposition (xp = x zero-padded by 1):
    #   o[co, 2qy+py, 2qx+px] = sum_{ci,dy,dx} xp[ci, qy+py+dy, qx+px+dx]
    #                                        * W[ci, co, 3-py-2dy, 3-px-2dx]
    # Each (phase, tap) window is a pure lane shift of the flattened padded input.
    for ph, (py, px) in enumerate(((0, 0), (0, 1), (1, 0), (1, 1))):
        yph = None
        for dy in range(2):
            for dx in range(2):
                off = (py + dy) * Wp + (px + dx)          # static lane offset
                win = xall[:, off:off + Pq]               # (TCin, Pq) shifted window
                if KT > 1:
                    wmat = w_ref[ph, dy * 2 + dx, :, pl.ds(koff, TCin)]
                else:
                    wmat = w_ref[ph, dy * 2 + dx]         # (TCout, TCin)
                d = jnp.dot(wmat, win, preferred_element_type=jnp.float32)
                yph = d if yph is None else yph + d

        @pl.when(k == 0)
        def _(ph=ph, yph=yph):
            out_ref[ph] = yph                             # init folded into first k step

        @pl.when(k > 0)
        def _(ph=ph, yph=yph):
            out_ref[ph] += yph

    @pl.when(k == KT - 1)
    def _finalize():
        y = out_ref[...]                                  # (4, TCout, Pq) fp32
        m = mask_ref[...]                                 # (1, Pq) -> broadcasts
        inv_n = 1.0 / float(4 * H * W)                    # true per-channel element count
        ym = y * m                                        # exclude pad columns from stats
        s = jnp.sum(ym, axis=(0, 2), keepdims=True)       # (1, TCout, 1)
        ss = jnp.sum(ym * y, axis=(0, 2), keepdims=True)
        mean = s * inv_n
        var = jnp.maximum(ss * inv_n - mean * mean, 0.0)  # clamp cancellation
        scale = lax.rsqrt(var + EPS)                      # EUP
        out_ref[...] = jnp.maximum((y - mean) * scale, 0.0).astype(out_ref.dtype)


def unet_up(x, skip, weight):
    """x: (N, Cin, H, W); skip: (N, Cs, 2H, 2W); weight: (Cin, Cout, 4, 4) (ConvTranspose2d, bias=False)."""
    N, Cin, H, W = x.shape
    Cout = weight.shape[1]
    Ho, Wo = 2 * H, 2 * W
    Wp = W + 2
    Pq = _round_up(H * Wp, 128)              # lane-dense padded spatial extent per phase
    max_off = 2 * Wp + 2                     # largest (phase, tap) window offset
    Lp = _round_up(Pq + max_off, 128)        # >= (H+2)*(W+2), keeps all slices in-bounds

    # ---- input: zero-pad by 1, flatten rows with pitch W+2, zero-pad the tail (bf16)
    xb = x.astype(jnp.bfloat16)
    xp = jnp.pad(xb, ((0, 0), (0, 0), (1, 1), (1, 1)))                   # (N, Cin, H+2, W+2)
    xflat = xp.reshape(N, Cin, (H + 2) * Wp)
    xflat = jnp.pad(xflat, ((0, 0), (0, 0), (0, Lp - (H + 2) * Wp)))     # (N, Cin, Lp)

    # ---- per-(phase, tap) weight matrices: (4, 4, Cout, Cin), phase = py*2+px, tap = dy*2+dx
    w_all = jnp.stack([
        jnp.stack([weight[:, :, 3 - py - 2 * dy, 3 - px - 2 * dx].T
                   for dy in range(2) for dx in range(2)], axis=0)
        for py in range(2) for px in range(2)], axis=0).astype(jnp.bfloat16)

    # ---- validity mask over the padded lane axis (in-row pad columns + tail excluded)
    q = jnp.arange(Pq, dtype=jnp.int32)
    mask = (((q % Wp) < W) & (q < H * Wp)).astype(jnp.float32)[None, :]  # (1, Pq)

    # ---- tile selection: VMEM-budget driven (Cout tile for MXU/megacore, Cin tile for K)
    if Cout > 256:
        TCout = next((c for c in (256, 128, 64, 32, 16, 8) if Cout % c == 0), Cout)
    else:
        TCout = Cout

    def vmem_need(tcin, tcout):
        return (2 * tcin * Lp * 2              # x block, double-buffered, bf16
                + 2 * 16 * tcout * Cin * 2     # weight block (full Cin), double-buffered
                + 2 * 4 * tcout * Pq * 4)      # fp32 output/accumulator block

    budget = 32 << 20
    TCin = Cin
    for cand in [c for c in (Cin, 512, 256, 128) if Cin % c == 0]:
        TCin = cand
        if vmem_need(cand, TCout) <= budget:
            break
    KT = Cin // TCin
    COT = Cout // TCout
    vmem_limit = int(min(56 << 20, max(32 << 20, int(1.5 * vmem_need(TCin, TCout)) + (8 << 20))))

    out = pl.pallas_call(
        functools.partial(_unet_up_kernel, H=H, W=W, TCin=TCin, KT=KT),
        out_shape=jax.ShapeDtypeStruct((N, 4, Cout, Pq), jnp.float32),
        grid_spec=pltpu.PrefetchScalarGridSpec(
            num_scalar_prefetch=0,
            grid=(N, COT, KT),
            in_specs=[
                pl.BlockSpec((None, TCin, Lp), lambda n, co, k: (n, k, 0)),
                pl.BlockSpec((4, 4, TCout, Cin), lambda n, co, k: (0, 0, co, 0)),
                pl.BlockSpec((1, Pq), lambda n, co, k: (0, 0)),
            ],
            out_specs=pl.BlockSpec((None, 4, TCout, Pq), lambda n, co, k: (n, 0, co, 0)),
        ),
        compiler_params=pltpu.CompilerParams(
            dimension_semantics=("parallel", "parallel", "arbitrary"),
            vmem_limit_bytes=vmem_limit),
    )(xflat, w_all, mask)

    # ---- strip pad columns, de-interleave the 4 phases (oy = 2qy+py, ox = 2qx+px), concat skip
    y = out[..., :H * Wp].reshape(N, 4, Cout, H, Wp)[..., :W]
    y = (y.reshape(N, 2, 2, Cout, H, W)
          .transpose(0, 3, 4, 1, 5, 2)
          .reshape(N, Cout, Ho, Wo)).astype(skip.dtype)
    # TODO(synk): the de-interleave + torch.cat glue could write into a pre-placed
    # (N, Cout+Cs, Ho, Wo) buffer via input_output_aliases to drop one output copy.
    return jnp.concatenate([y, skip], axis=1)
    # TODO(synk): nn.Dropout branch not instantiated (default dropout=0.0 -> layer absent).


def _reference(x, skip, weight):
    # Independent reference: XLA dilated conv (same bf16 input quantization, fp32
    # accumulation) + plain-JAX instance norm / relu / concat.
    xb = x.astype(jnp.bfloat16)
    w_conv = weight[:, :, ::-1, ::-1].transpose(1, 0, 2, 3).astype(jnp.bfloat16)  # (Cout, Cin, 4, 4)
    y = lax.conv_general_dilated(
        xb, w_conv, window_strides=(1, 1), padding=((2, 2), (2, 2)),
        lhs_dilation=(2, 2), dimension_numbers=("NCHW", "OIHW", "NCHW"),
        preferred_element_type=jnp.float32)
    mean = y.mean(axis=(2, 3), keepdims=True)
    var = ((y - mean) ** 2).mean(axis=(2, 3), keepdims=True)
    y = jnp.maximum((y - mean) / jnp.sqrt(var + EPS), 0.0).astype(x.dtype)
    return jnp.concatenate([y, skip], axis=1)


if __name__ == "__main__":
    key = jax.random.PRNGKey(0)
    k1, k2, k3 = jax.random.split(key, 3)
    N, Cin, Cout, H, W = 2, 8, 8, 16, 16
    x = jax.random.normal(k1, (N, Cin, H, W), jnp.float32)
    skip = jax.random.normal(k2, (N, Cout, 2 * H, 2 * W), jnp.float32)
    # ConvTranspose2d weight, shape (in_size, out_size, 4, 4), bias=False
    weight = jax.random.normal(k3, (Cin, Cout, 4, 4), jnp.float32) * 0.1

    out = jax.block_until_ready(jax.jit(unet_up)(x, skip, weight))
    ref = _reference(x, skip, weight)
    assert out.shape == (N, 2 * Cout, 2 * H, 2 * W), out.shape
    assert jnp.allclose(out, ref, atol=2e-3, rtol=2e-3), float(jnp.max(jnp.abs(out - ref)))
    print("KERNEL_OK")
</pallas_src>

<mosaic_0001>
module attributes {stable_mosaic.version = 11 : i64} {
  func.func @_unet_up_kernel(%arg0: i32, %arg1: i32, %arg2: i32, %arg3: memref<1x8x512xbf16, #tpu.memory_space<vmem>>, %arg4: memref<4x4x8x8xbf16, #tpu.memory_space<vmem>>, %arg5: memref<1x384xf32, #tpu.memory_space<vmem>>, %arg6: memref<1x4x8x384xf32, #tpu.memory_space<vmem>>) attributes {dimension_semantics = [#tpu.dimension_semantics<parallel>, #tpu.dimension_semantics<parallel>, #tpu.dimension_semantics<arbitrary>], iteration_bounds = array<i64: 2, 1, 1>, scalar_prefetch = 0 : i64, scratch_operands = 0 : i64, tpu.core_type = #tpu.core_type<tc>, window_params = [{transform_indices = @transform_0, window_bounds = array<i64: 1, 8, 512>}, {transform_indices = @transform_1, window_bounds = array<i64: 4, 4, 8, 8>}, {pipeline_mode = #tpu.pipeline_mode<synchronous>, transform_indices = @transform_2, window_bounds = array<i64: 1, 384>}, {transform_indices = @transform_3, window_bounds = array<i64: 1, 4, 8, 384>}]} {
    %c0 = arith.constant 0 : index
    %c0_0 = arith.constant 0 : index
    %c0_1 = arith.constant 0 : index
    %0 = vector.load %arg3[%c0, %c0_0, %c0_1] : memref<1x8x512xbf16, #tpu.memory_space<vmem>>, vector<1x8x512xbf16>
    %1 = vector.shape_cast %0 : vector<1x8x512xbf16> to vector<8x512xbf16>
    %2 = vector.extract_strided_slice %1 {offsets = [0, 0], sizes = [8, 384], strides = [1, 1]} : vector<8x512xbf16> to vector<8x384xbf16>
    %c0_2 = arith.constant 0 : index
    %c0_3 = arith.constant 0 : index
    %c0_4 = arith.constant 0 : index
    %c0_5 = arith.constant 0 : index
    %3 = vector.load %arg4[%c0_2, %c0_3, %c0_4, %c0_5] : memref<4x4x8x8xbf16, #tpu.memory_space<vmem>>, vector<1x1x8x8xbf16>
    %4 = vector.shape_cast %3 : vector<1x1x8x8xbf16> to vector<8x8xbf16>
    %cst = arith.constant dense<0.000000e+00> : vector<8x384xf32>
    %5 = tpu.matmul %4, %2, %cst {dimension_numbers = #tpu.dot_dimension_numbers<[1], [0], [0], [1], [0, 0, 1, 1], [], []>} : vector<8x8xbf16>, vector<8x384xbf16>, vector<8x384xf32> -> vector<8x384xf32>
    %6 = vector.extract_strided_slice %1 {offsets = [0, 1], sizes = [8, 384], strides = [1, 1]} : vector<8x512xbf16> to vector<8x384xbf16>
    %c0_6 = arith.constant 0 : index
    %c1 = arith.constant 1 : index
    %c0_7 = arith.constant 0 : index
    %c0_8 = arith.constant 0 : index
    %7 = vector.load %arg4[%c0_6, %c1, %c0_7, %c0_8] : memref<4x4x8x8xbf16, #tpu.memory_space<vmem>>, vector<1x1x8x8xbf16>
    %8 = vector.shape_cast %7 : vector<1x1x8x8xbf16> to vector<8x8xbf16>
    %cst_9 = arith.constant dense<0.000000e+00> : vector<8x384xf32>
    %9 = tpu.matmul %8, %6, %cst_9 {dimension_numbers = #tpu.dot_dimension_numbers<[1], [0], [0], [1], [0, 0, 1, 1], [], []>} : vector<8x8xbf16>, vector<8x384xbf16>, vector<8x384xf32> -> vector<8x384xf32>
    %10 = arith.addf %5, %9 : vector<8x384xf32>
    %11 = vector.extract_strided_slice %1 {offsets = [0, 18], sizes = [8, 384], strides = [1, 1]} : vector<8x512xbf16> to vector<8x384xbf16>
    %c0_10 = arith.constant 0 : index
    %c2 = arith.constant 2 : index
    %c0_11 = arith.constant 0 : index
    %c0_12 = arith.constant 0 : index
    %12 = vector.load %arg4[%c0_10, %c2, %c0_11, %c0_12] : memref<4x4x8x8xbf16, #tpu.memory_space<vmem>>, vector<1x1x8x8xbf16>
    %13 = vector.shape_cast %12 : vector<1x1x8x8xbf16> to vector<8x8xbf16>
    %cst_13 = arith.constant dense<0.000000e+00> : vector<8x384xf32>
    %14 = tpu.matmul %13, %11, %cst_13 {dimension_numbers = #tpu.dot_dimension_numbers<[1], [0], [0], [1], [0, 0, 1, 1], [], []>} : vector<8x8xbf16>, vector<8x384xbf16>, vector<8x384xf32> -> vector<8x384xf32>
    %15 = arith.addf %10, %14 : vector<8x384xf32>
    %16 = vector.extract_strided_slice %1 {offsets = [0, 19], sizes = [8, 384], strides = [1, 1]} : vector<8x512xbf16> to vector<8x384xbf16>
    %c0_14 = arith.constant 0 : index
    %c3 = arith.constant 3 : index
    %c0_15 = arith.constant 0 : index
    %c0_16 = arith.constant 0 : index
    %17 = vector.load %arg4[%c0_14, %c3, %c0_15, %c0_16] : memref<4x4x8x8xbf16, #tpu.memory_space<vmem>>, vector<1x1x8x8xbf16>
    %18 = vector.shape_cast %17 : vector<1x1x8x8xbf16> to vector<8x8xbf16>
    %cst_17 = arith.constant dense<0.000000e+00> : vector<8x384xf32>
    %19 = tpu.matmul %18, %16, %cst_17 {dimension_numbers = #tpu.dot_dimension_numbers<[1], [0], [0], [1], [0, 0, 1, 1], [], []>} : vector<8x8xbf16>, vector<8x384xbf16>, vector<8x384xf32> -> vector<8x384xf32>
    %20 = arith.addf %15, %19 : vector<8x384xf32>
    %c0_i32 = arith.constant 0 : i32
    %21 = arith.cmpi eq, %arg2, %c0_i32 : i32
    %22 = arith.extui %21 : i1 to i32
    %c0_i32_18 = arith.constant 0 : i32
    %23 = arith.cmpi ne, %22, %c0_i32_18 : i32
    scf.if %23 {
      %c0_95 = arith.constant 0 : index
      %c0_96 = arith.constant 0 : index
      %c0_97 = arith.constant 0 : index
      %c0_98 = arith.constant 0 : index
      %105 = vector.load %arg6[%c0_95, %c0_96, %c0_97, %c0_98] : memref<1x4x8x384xf32, #tpu.memory_space<vmem>>, vector<1x1x8x384xf32>
      %106 = vector.shape_cast %105 : vector<1x1x8x384xf32> to vector<8x384xf32>
      %107 = vector.shape_cast %20 : vector<8x384xf32> to vector<1x1x8x384xf32>
      tpu.vector_store %arg6[%c0_95, %c0_96, %c0_97, %c0_98], %107 {strides = array<i32>} : memref<1x4x8x384xf32, #tpu.memory_space<vmem>>, vector<1x1x8x384xf32>,
    } else {
    }
    %c0_i32_19 = arith.constant 0 : i32
    %24 = arith.cmpi sgt, %arg2, %c0_i32_19 : i32
    %25 = arith.extui %24 : i1 to i32
    %c0_i32_20 = arith.constant 0 : i32
    %26 = arith.cmpi ne, %25, %c0_i32_20 : i32
    scf.if %26 {
      %c0_95 = arith.constant 0 : index
      %c0_96 = arith.constant 0 : index
      %c0_97 = arith.constant 0 : index
      %c0_98 = arith.constant 0 : index
      %105 = vector.load %arg6[%c0_95, %c0_96, %c0_97, %c0_98] : memref<1x4x8x384xf32, #tpu.memory_space<vmem>>, vector<1x1x8x384xf32>
      %106 = vector.shape_cast %105 : vector<1x1x8x384xf32> to vector<8x384xf32>
      %107 = arith.addf %106, %20 : vector<8x384xf32>
      %c0_99 = arith.constant 0 : index
      %c0_100 = arith.constant 0 : index
      %c0_101 = arith.constant 0 : index
      %c0_102 = arith.constant 0 : index
      %108 = vector.load %arg6[%c0_99, %c0_100, %c0_101, %c0_102] : memref<1x4x8x384xf32, #tpu.memory_space<vmem>>, vector<1x1x8x384xf32>
      %109 = vector.shape_cast %108 : vector<1x1x8x384xf32> to vector<8x384xf32>
      %110 = vector.shape_cast %107 : vector<8x384xf32> to vector<1x1x8x384xf32>
      tpu.vector_store %arg6[%c0_99, %c0_100, %c0_101, %c0_102], %110 {strides = array<i32>} : memref<1x4x8x384xf32, #tpu.memory_space<vmem>>, vector<1x1x8x384xf32>,
    } else {
    }
    %27 = vector.extract_strided_slice %1 {offsets = [0, 1], sizes = [8, 384], strides = [1, 1]} : vector<8x512xbf16> to vector<8x384xbf16>
    %c1_21 = arith.constant 1 : index
    %c0_22 = arith.constant 0 : index
    %c0_23 = arith.constant 0 : index
    %c0_24 = arith.constant 0 : index
    %28 = vector.load %arg4[%c1_21, %c0_22, %c0_23, %c0_24] : memref<4x4x8x8xbf16, #tpu.memory_space<vmem>>, vector<1x1x8x8xbf16>
    %29 = vector.shape_cast %28 : vector<1x1x8x8xbf16> to vector<8x8xbf16>
    %cst_25 = arith.constant dense<0.000000e+00> : vector<8x384xf32>
    %30 = tpu.matmul %29, %27, %cst_25 {dimension_numbers = #tpu.dot_dimension_numbers<[1], [0], [0], [1], [0, 0, 1, 1], [], []>} : vector<8x8xbf16>, vector<8x384xbf16>, vector<8x384xf32> -> vector<8x384xf32>
    %31 = vector.extract_strided_slice %1 {offsets = [0, 2], sizes = [8, 384], strides = [1, 1]} : vector<8x512xbf16> to vector<8x384xbf16>
    %c1_26 = arith.constant 1 : index
    %c1_27 = arith.constant 1 : index
    %c0_28 = arith.constant 0 : index
    %c0_29 = arith.constant 0 : index
    %32 = vector.load %arg4[%c1_26, %c1_27, %c0_28, %c0_29] : memref<4x4x8x8xbf16, #tpu.memory_space<vmem>>, vector<1x1x8x8xbf16>
    %33 = vector.shape_cast %32 : vector<1x1x8x8xbf16> to vector<8x8xbf16>
    %cst_30 = arith.constant dense<0.000000e+00> : vector<8x384xf32>
    %34 = tpu.matmul %33, %31, %cst_30 {dimension_numbers = #tpu.dot_dimension_numbers<[1], [0], [0], [1], [0, 0, 1, 1], [], []>} : vector<8x8xbf16>, vector<8x384xbf16>, vector<8x384xf32> -> vector<8x384xf32>
    %35 = arith.addf %30, %34 : vector<8x384xf32>
    %36 = vector.extract_strided_slice %1 {offsets = [0, 19], sizes = [8, 384], strides = [1, 1]} : vector<8x512xbf16> to vector<8x384xbf16>
    %c1_31 = arith.constant 1 : index
    %c2_32 = arith.constant 2 : index
    %c0_33 = arith.constant 0 : index
    %c0_34 = arith.constant 0 : index
    %37 = vector.load %arg4[%c1_31, %c2_32, %c0_33, %c0_34] : memref<4x4x8x8xbf16, #tpu.memory_space<vmem>>, vector<1x1x8x8xbf16>
    %38 = vector.shape_cast %37 : vector<1x1x8x8xbf16> to vector<8x8xbf16>
    %cst_35 = arith.constant dense<0.000000e+00> : vector<8x384xf32>
    %39 = tpu.matmul %38, %36, %cst_35 {dimension_numbers = #tpu.dot_dimension_numbers<[1], [0], [0], [1], [0, 0, 1, 1], [], []>} : vector<8x8xbf16>, vector<8x384xbf16>, vector<8x384xf32> -> vector<8x384xf32>
    %40 = arith.addf %35, %39 : vector<8x384xf32>
    %41 = vector.extract_strided_slice %1 {offsets = [0, 20], sizes = [8, 384], strides = [1, 1]} : vector<8x512xbf16> to vector<8x384xbf16>
    %c1_36 = arith.constant 1 : index
    %c3_37 = arith.constant 3 : index
    %c0_38 = arith.constant 0 : index
    %c0_39 = arith.constant 0 : index
    %42 = vector.load %arg4[%c1_36, %c3_37, %c0_38, %c0_39] : memref<4x4x8x8xbf16, #tpu.memory_space<vmem>>, vector<1x1x8x8xbf16>
    %43 = vector.shape_cast %42 : vector<1x1x8x8xbf16> to vector<8x8xbf16>
    %cst_40 = arith.constant dense<0.000000e+00> : vector<8x384xf32>
    %44 = tpu.matmul %43, %41, %cst_40 {dimension_numbers = #tpu.dot_dimension_numbers<[1], [0], [0], [1], [0, 0, 1, 1], [], []>} : vector<8x8xbf16>, vector<8x384xbf16>, vector<8x384xf32> -> vector<8x384xf32>
    %45 = arith.addf %40, %44 : vector<8x384xf32>
    %c0_i32_41 = arith.constant 0 : i32
    %46 = arith.cmpi eq, %arg2, %c0_i32_41 : i32
    %47 = arith.extui %46 : i1 to i32
    %c0_i32_42 = arith.constant 0 : i32
    %48 = arith.cmpi ne, %47, %c0_i32_42 : i32
    scf.if %48 {
      %c0_95 = arith.constant 0 : index
      %c1_96 = arith.constant 1 : index
      %c0_97 = arith.constant 0 : index
      %c0_98 = arith.constant 0 : index
      %105 = vector.load %arg6[%c0_95, %c1_96, %c0_97, %c0_98] : memref<1x4x8x384xf32, #tpu.memory_space<vmem>>, vector<1x1x8x384xf32>
      %106 = vector.shape_cast %105 : vector<1x1x8x384xf32> to vector<8x384xf32>
      %107 = vector.shape_cast %45 : vector<8x384xf32> to vector<1x1x8x384xf32>
      tpu.vector_store %arg6[%c0_95, %c1_96, %c0_97, %c0_98], %107 {strides = array<i32>} : memref<1x4x8x384xf32, #tpu.memory_space<vmem>>, vector<1x1x8x384xf32>,
    } else {
    }
    %c0_i32_43 = arith.constant 0 : i32
    %49 = arith.cmpi sgt, %arg2, %c0_i32_43 : i32
    %50 = arith.extui %49 : i1 to i32
    %c0_i32_44 = arith.constant 0 : i32
    %51 = arith.cmpi ne, %50, %c0_i32_44 : i32
    scf.if %51 {
      %c0_95 = arith.constant 0 : index
      %c1_96 = arith.constant 1 : index
      %c0_97 = arith.constant 0 : index
      %c0_98 = arith.constant 0 : index
      %105 = vector.load %arg6[%c0_95, %c1_96, %c0_97, %c0_98] : memref<1x4x8x384xf32, #tpu.memory_space<vmem>>, vector<1x1x8x384xf32>
      %106 = vector.shape_cast %105 : vector<1x1x8x384xf32> to vector<8x384xf32>
      %107 = arith.addf %106, %45 : vector<8x384xf32>
      %c0_99 = arith.constant 0 : index
      %c1_100 = arith.constant 1 : index
      %c0_101 = arith.constant 0 : index
      %c0_102 = arith.constant 0 : index
      %108 = vector.load %arg6[%c0_99, %c1_100, %c0_101, %c0_102] : memref<1x4x8x384xf32, #tpu.memory_space<vmem>>, vector<1x1x8x384xf32>
      %109 = vector.shape_cast %108 : vector<1x1x8x384xf32> to vector<8x384xf32>
      %110 = vector.shape_cast %107 : vector<8x384xf32> to vector<1x1x8x384xf32>
      tpu.vector_store %arg6[%c0_99, %c1_100, %c0_101, %c0_102], %110 {strides = array<i32>} : memref<1x4x8x384xf32, #tpu.memory_space<vmem>>, vector<1x1x8x384xf32>,
    } else {
    }
    %52 = vector.extract_strided_slice %1 {offsets = [0, 18], sizes = [8, 384], strides = [1, 1]} : vector<8x512xbf16> to vector<8x384xbf16>
    %c2_45 = arith.constant 2 : index
    %c0_46 = arith.constant 0 : index
    %c0_47 = arith.constant 0 : index
    %c0_48 = arith.constant 0 : index
    %53 = vector.load %arg4[%c2_45, %c0_46, %c0_47, %c0_48] : memref<4x4x8x8xbf16, #tpu.memory_space<vmem>>, vector<1x1x8x8xbf16>
    %54 = vector.shape_cast %53 : vector<1x1x8x8xbf16> to vector<8x8xbf16>
    %cst_49 = arith.constant dense<0.000000e+00> : vector<8x384xf32>
    %55 = tpu.matmul %54, %52, %cst_49 {dimension_numbers = #tpu.dot_dimension_numbers<[1], [0], [0], [1], [0, 0, 1, 1], [], []>} : vector<8x8xbf16>, vector<8x384xbf16>, vector<8x384xf32> -> vector<8x384xf32>
    %56 = vector.extract_strided_slice %1 {offsets = [0, 19], sizes = [8, 384], strides = [1, 1]} : vector<8x512xbf16> to vector<8x384xbf16>
    %c2_50 = arith.constant 2 : index
    %c1_51 = arith.constant 1 : index
    %c0_52 = arith.constant 0 : index
    %c0_53 = arith.constant 0 : index
    %57 = vector.load %arg4[%c2_50, %c1_51, %c0_52, %c0_53] : memref<4x4x8x8xbf16, #tpu.memory_space<vmem>>, vector<1x1x8x8xbf16>
    %58 = vector.shape_cast %57 : vector<1x1x8x8xbf16> to vector<8x8xbf16>
    %cst_54 = arith.constant dense<0.000000e+00> : vector<8x384xf32>
    %59 = tpu.matmul %58, %56, %cst_54 {dimension_numbers = #tpu.dot_dimension_numbers<[1], [0], [0], [1], [0, 0, 1, 1], [], []>} : vector<8x8xbf16>, vector<8x384xbf16>, vector<8x384xf32> -> vector<8x384xf32>
    %60 = arith.addf %55, %59 : vector<8x384xf32>
    %61 = vector.extract_strided_slice %1 {offsets = [0, 36], sizes = [8, 384], strides = [1, 1]} : vector<8x512xbf16> to vector<8x384xbf16>
    %c2_55 = arith.constant 2 : index
    %c2_56 = arith.constant 2 : index
    %c0_57 = arith.constant 0 : index
    %c0_58 = arith.constant 0 : index
    %62 = vector.load %arg4[%c2_55, %c2_56, %c0_57, %c0_58] : memref<4x4x8x8xbf16, #tpu.memory_space<vmem>>, vector<1x1x8x8xbf16>
    %63 = vector.shape_cast %62 : vector<1x1x8x8xbf16> to vector<8x8xbf16>
    %cst_59 = arith.constant dense<0.000000e+00> : vector<8x384xf32>
    %64 = tpu.matmul %63, %61, %cst_59 {dimension_numbers = #tpu.dot_dimension_numbers<[1], [0], [0], [1], [0, 0, 1, 1], [], []>} : vector<8x8xbf16>, vector<8x384xbf16>, vector<8x384xf32> -> vector<8x384xf32>
    %65 = arith.addf %60, %64 : vector<8x384xf32>
    %66 = vector.extract_strided_slice %1 {offsets = [0, 37], sizes = [8, 384], strides = [1, 1]} : vector<8x512xbf16> to vector<8x384xbf16>
    %c2_60 = arith.constant 2 : index
    %c3_61 = arith.constant 3 : index
    %c0_62 = arith.constant 0 : index
    %c0_63 = arith.constant 0 : index
    %67 = vector.load %arg4[%c2_60, %c3_61, %c0_62, %c0_63] : memref<4x4x8x8xbf16, #tpu.memory_space<vmem>>, vector<1x1x8x8xbf16>
    %68 = vector.shape_cast %67 : vector<1x1x8x8xbf16> to vector<8x8xbf16>
    %cst_64 = arith.constant dense<0.000000e+00> : vector<8x384xf32>
    %69 = tpu.matmul %68, %66, %cst_64 {dimension_numbers = #tpu.dot_dimension_numbers<[1], [0], [0], [1], [0, 0, 1, 1], [], []>} : vector<8x8xbf16>, vector<8x384xbf16>, vector<8x384xf32> -> vector<8x384xf32>
    %70 = arith.addf %65, %69 : vector<8x384xf32>
    %c0_i32_65 = arith.constant 0 : i32
    %71 = arith.cmpi eq, %arg2, %c0_i32_65 : i32
    %72 = arith.extui %71 : i1 to i32
    %c0_i32_66 = arith.constant 0 : i32
    %73 = arith.cmpi ne, %72, %c0_i32_66 : i32
    scf.if %73 {
      %c0_95 = arith.constant 0 : index
      %c2_96 = arith.constant 2 : index
      %c0_97 = arith.constant 0 : index
      %c0_98 = arith.constant 0 : index
      %105 = vector.load %arg6[%c0_95, %c2_96, %c0_97, %c0_98] : memref<1x4x8x384xf32, #tpu.memory_space<vmem>>, vector<1x1x8x384xf32>
      %106 = vector.shape_cast %105 : vector<1x1x8x384xf32> to vector<8x384xf32>
      %107 = vector.shape_cast %70 : vector<8x384xf32> to vector<1x1x8x384xf32>
      tpu.vector_store %arg6[%c0_95, %c2_96, %c0_97, %c0_98], %107 {strides = array<i32>} : memref<1x4x8x384xf32, #tpu.memory_space<vmem>>, vector<1x1x8x384xf32>,
    } else {
    }
    %c0_i32_67 = arith.constant 0 : i32
    %74 = arith.cmpi sgt, %arg2, %c0_i32_67 : i32
    %75 = arith.extui %74 : i1 to i32
    %c0_i32_68 = arith.constant 0 : i32
    %76 = arith.cmpi ne, %75, %c0_i32_68 : i32
    scf.if %76 {
      %c0_95 = arith.constant 0 : index
      %c2_96 = arith.constant 2 : index
      %c0_97 = arith.constant 0 : index
      %c0_98 = arith.constant 0 : index
      %105 = vector.load %arg6[%c0_95, %c2_96, %c0_97, %c0_98] : memref<1x4x8x384xf32, #tpu.memory_space<vmem>>, vector<1x1x8x384xf32>
      %106 = vector.shape_cast %105 : vector<1x1x8x384xf32> to vector<8x384xf32>
      %107 = arith.addf %106, %70 : vector<8x384xf32>
      %c0_99 = arith.constant 0 : index
      %c2_100 = arith.constant 2 : index
      %c0_101 = arith.constant 0 : index
      %c0_102 = arith.constant 0 : index
      %108 = vector.load %arg6[%c0_99, %c2_100, %c0_101, %c0_102] : memref<1x4x8x384xf32, #tpu.memory_space<vmem>>, vector<1x1x8x384xf32>
      %109 = vector.shape_cast %108 : vector<1x1x8x384xf32> to vector<8x384xf32>
      %110 = vector.shape_cast %107 : vector<8x384xf32> to vector<1x1x8x384xf32>
      tpu.vector_store %arg6[%c0_99, %c2_100, %c0_101, %c0_102], %110 {strides = array<i32>} : memref<1x4x8x384xf32, #tpu.memory_space<vmem>>, vector<1x1x8x384xf32>,
    } else {
    }
    %77 = vector.extract_strided_slice %1 {offsets = [0, 19], sizes = [8, 384], strides = [1, 1]} : vector<8x512xbf16> to vector<8x384xbf16>
    %c3_69 = arith.constant 3 : index
    %c0_70 = arith.constant 0 : index
    %c0_71 = arith.constant 0 : index
    %c0_72 = arith.constant 0 : index
    %78 = vector.load %arg4[%c3_69, %c0_70, %c0_71, %c0_72] : memref<4x4x8x8xbf16, #tpu.memory_space<vmem>>, vector<1x1x8x8xbf16>
    %79 = vector.shape_cast %78 : vector<1x1x8x8xbf16> to vector<8x8xbf16>
    %cst_73 = arith.constant dense<0.000000e+00> : vector<8x384xf32>
    %80 = tpu.matmul %79, %77, %cst_73 {dimension_numbers = #tpu.dot_dimension_numbers<[1], [0], [0], [1], [0, 0, 1, 1], [], []>} : vector<8x8xbf16>, vector<8x384xbf16>, vector<8x384xf32> -> vector<8x384xf32>
    %81 = vector.extract_strided_slice %1 {offsets = [0, 20], sizes = [8, 384], strides = [1, 1]} : vector<8x512xbf16> to vector<8x384xbf16>
    %c3_74 = arith.constant 3 : index
    %c1_75 = arith.constant 1 : index
    %c0_76 = arith.constant 0 : index
    %c0_77 = arith.constant 0 : index
    %82 = vector.load %arg4[%c3_74, %c1_75, %c0_76, %c0_77] : memref<4x4x8x8xbf16, #tpu.memory_space<vmem>>, vector<1x1x8x8xbf16>
    %83 = vector.shape_cast %82 : vector<1x1x8x8xbf16> to vector<8x8xbf16>
    %cst_78 = arith.constant dense<0.000000e+00> : vector<8x384xf32>
    %84 = tpu.matmul %83, %81, %cst_78 {dimension_numbers = #tpu.dot_dimension_numbers<[1], [0], [0], [1], [0, 0, 1, 1], [], []>} : vector<8x8xbf16>, vector<8x384xbf16>, vector<8x384xf32> -> vector<8x384xf32>
    %85 = arith.addf %80, %84 : vector<8x384xf32>
    %86 = vector.extract_strided_slice %1 {offsets = [0, 37], sizes = [8, 384], strides = [1, 1]} : vector<8x512xbf16> to vector<8x384xbf16>
    %c3_79 = arith.constant 3 : index
    %c2_80 = arith.constant 2 : index
    %c0_81 = arith.constant 0 : index
    %c0_82 = arith.constant 0 : index
    %87 = vector.load %arg4[%c3_79, %c2_80, %c0_81, %c0_82] : memref<4x4x8x8xbf16, #tpu.memory_space<vmem>>, vector<1x1x8x8xbf16>
    %88 = vector.shape_cast %87 : vector<1x1x8x8xbf16> to vector<8x8xbf16>
    %cst_83 = arith.constant dense<0.000000e+00> : vector<8x384xf32>
    %89 = tpu.matmul %88, %86, %cst_83 {dimension_numbers = #tpu.dot_dimension_numbers<[1], [0], [0], [1], [0, 0, 1, 1], [], []>} : vector<8x8xbf16>, vector<8x384xbf16>, vector<8x384xf32> -> vector<8x384xf32>
    %90 = arith.addf %85, %89 : vector<8x384xf32>
    %91 = vector.extract_strided_slice %1 {offsets = [0, 38], sizes = [8, 384], strides = [1, 1]} : vector<8x512xbf16> to vector<8x384xbf16>
    %c3_84 = arith.constant 3 : index
    %c3_85 = arith.constant 3 : index
    %c0_86 = arith.constant 0 : index
    %c0_87 = arith.constant 0 : index
    %92 = vector.load %arg4[%c3_84, %c3_85, %c0_86, %c0_87] : memref<4x4x8x8xbf16, #tpu.memory_space<vmem>>, vector<1x1x8x8xbf16>
    %93 = vector.shape_cast %92 : vector<1x1x8x8xbf16> to vector<8x8xbf16>
    %cst_88 = arith.constant dense<0.000000e+00> : vector<8x384xf32>
    %94 = tpu.matmul %93, %91, %cst_88 {dimension_numbers = #tpu.dot_dimension_numbers<[1], [0], [0], [1], [0, 0, 1, 1], [], []>} : vector<8x8xbf16>, vector<8x384xbf16>, vector<8x384xf32> -> vector<8x384xf32>
    %95 = arith.addf %90, %94 : vector<8x384xf32>
    %c0_i32_89 = arith.constant 0 : i32
    %96 = arith.cmpi eq, %arg2, %c0_i32_89 : i32
    %97 = arith.extui %96 : i1 to i32
    %c0_i32_90 = arith.constant 0 : i32
    %98 = arith.cmpi ne, %97, %c0_i32_90 : i32
    scf.if %98 {
      %c0_95 = arith.constant 0 : index
      %c3_96 = arith.constant 3 : index
      %c0_97 = arith.constant 0 : index
      %c0_98 = arith.constant 0 : index
      %105 = vector.load %arg6[%c0_95, %c3_96, %c0_97, %c0_98] : memref<1x4x8x384xf32, #tpu.memory_space<vmem>>, vector<1x1x8x384xf32>
      %106 = vector.shape_cast %105 : vector<1x1x8x384xf32> to vector<8x384xf32>
      %107 = vector.shape_cast %95 : vector<8x384xf32> to vector<1x1x8x384xf32>
      tpu.vector_store %arg6[%c0_95, %c3_96, %c0_97, %c0_98], %107 {strides = array<i32>} : memref<1x4x8x384xf32, #tpu.memory_space<vmem>>, vector<1x1x8x384xf32>,
    } else {
    }
    %c0_i32_91 = arith.constant 0 : i32
    %99 = arith.cmpi sgt, %arg2, %c0_i32_91 : i32
    %100 = arith.extui %99 : i1 to i32
    %c0_i32_92 = arith.constant 0 : i32
    %101 = arith.cmpi ne, %100, %c0_i32_92 : i32
    scf.if %101 {
      %c0_95 = arith.constant 0 : index
      %c3_96 = arith.constant 3 : index
      %c0_97 = arith.constant 0 : index
      %c0_98 = arith.constant 0 : index
      %105 = vector.load %arg6[%c0_95, %c3_96, %c0_97, %c0_98] : memref<1x4x8x384xf32, #tpu.memory_space<vmem>>, vector<1x1x8x384xf32>
      %106 = vector.shape_cast %105 : vector<1x1x8x384xf32> to vector<8x384xf32>
      %107 = arith.addf %106, %95 : vector<8x384xf32>
      %c0_99 = arith.constant 0 : index
      %c3_100 = arith.constant 3 : index
      %c0_101 = arith.constant 0 : index
      %c0_102 = arith.constant 0 : index
      %108 = vector.load %arg6[%c0_99, %c3_100, %c0_101, %c0_102] : memref<1x4x8x384xf32, #tpu.memory_space<vmem>>, vector<1x1x8x384xf32>
      %109 = vector.shape_cast %108 : vector<1x1x8x384xf32> to vector<8x384xf32>
      %110 = vector.shape_cast %107 : vector<8x384xf32> to vector<1x1x8x384xf32>
      tpu.vector_store %arg6[%c0_99, %c3_100, %c0_101, %c0_102], %110 {strides = array<i32>} : memref<1x4x8x384xf32, #tpu.memory_space<vmem>>, vector<1x1x8x384xf32>,
    } else {
    }
    %c0_i32_93 = arith.constant 0 : i32
    %102 = arith.cmpi eq, %arg2, %c0_i32_93 : i32
    %103 = arith.extui %102 : i1 to i32
    %c0_i32_94 = arith.constant 0 : i32
    %104 = arith.cmpi ne, %103, %c0_i32_94 : i32
    scf.if %104 {
      %c0_95 = arith.constant 0 : index
      %c0_96 = arith.constant 0 : index
      %c0_97 = arith.constant 0 : index
      %c0_98 = arith.constant 0 : index
      %105 = vector.load %arg6[%c0_95, %c0_96, %c0_97, %c0_98] : memref<1x4x8x384xf32, #tpu.memory_space<vmem>>, vector<1x4x8x384xf32>
      %106 = vector.shape_cast %105 : vector<1x4x8x384xf32> to vector<4x8x384xf32>
      %c0_99 = arith.constant 0 : index
      %c0_100 = arith.constant 0 : index
      %107 = vector.load %arg5[%c0_99, %c0_100] : memref<1x384xf32, #tpu.memory_space<vmem>>, vector<1x384xf32>
      %108 = vector.shape_cast %107 : vector<1x384xf32> to vector<1x1x384xf32>
      %109 = vector.broadcast %108 : vector<1x1x384xf32> to vector<4x8x384xf32>
      %110 = arith.mulf %106, %109 : vector<4x8x384xf32>
      %cst_101 = arith.constant dense<0.000000e+00> : vector<8xf32>
      %111 = vector.multi_reduction <add>, %110, %cst_101 [0, 2] : vector<4x8x384xf32> to vector<8xf32>
      %112 = vector.shape_cast %111 : vector<8xf32> to vector<1x8x1xf32>
      %113 = arith.mulf %110, %106 : vector<4x8x384xf32>
      %cst_102 = arith.constant dense<0.000000e+00> : vector<8xf32>
      %114 = vector.multi_reduction <add>, %113, %cst_102 [0, 2] : vector<4x8x384xf32> to vector<8xf32>
      %115 = vector.shape_cast %114 : vector<8xf32> to vector<1x8x1xf32>
      %cst_103 = arith.constant 9.765625E-4 : f32
      %116 = vector.broadcast %cst_103 : f32 to vector<1x8x1xf32>
      %117 = arith.mulf %112, %116 : vector<1x8x1xf32>
      %cst_104 = arith.constant 9.765625E-4 : f32
      %118 = vector.broadcast %cst_104 : f32 to vector<1x8x1xf32>
      %119 = arith.mulf %115, %118 : vector<1x8x1xf32>
      %120 = arith.mulf %117, %117 : vector<1x8x1xf32>
      %121 = arith.subf %119, %120 : vector<1x8x1xf32>
      %cst_105 = arith.constant 0.000000e+00 : f32
      %122 = vector.broadcast %cst_105 : f32 to vector<1x8x1xf32>
      %123 = arith.maximumf %121, %122 : vector<1x8x1xf32>
      %cst_106 = arith.constant 9.99999974E-6 : f32
      %124 = vector.broadcast %cst_106 : f32 to vector<1x8x1xf32>
      %125 = arith.addf %123, %124 : vector<1x8x1xf32>
      %126 = math.rsqrt %125 : vector<1x8x1xf32>
      %127 = vector.broadcast %117 : vector<1x8x1xf32> to vector<4x8x384xf32>
      %128 = arith.subf %106, %127 : vector<4x8x384xf32>
      %129 = vector.broadcast %126 : vector<1x8x1xf32> to vector<4x8x384xf32>
      %130 = arith.mulf %128, %129 : vector<4x8x384xf32>
      %cst_107 = arith.constant 0.000000e+00 : f32
      %131 = vector.broadcast %cst_107 : f32 to vector<4x8x384xf32>
      %132 = arith.maximumf %130, %131 : vector<4x8x384xf32>
      %c0_108 = arith.constant 0 : index
      %c0_109 = arith.constant 0 : index
      %c0_110 = arith.constant 0 : index
      %c0_111 = arith.constant 0 : index
      %133 = vector.load %arg6[%c0_108, %c0_109, %c0_110, %c0_111] : memref<1x4x8x384xf32, #tpu.memory_space<vmem>>, vector<1x4x8x384xf32>
      %134 = vector.shape_cast %133 : vector<1x4x8x384xf32> to vector<4x8x384xf32>
      %135 = vector.shape_cast %132 : vector<4x8x384xf32> to vector<1x4x8x384xf32>
      tpu.vector_store %arg6[%c0_108, %c0_109, %c0_110, %c0_111], %135 {strides = array<i32>} : memref<1x4x8x384xf32, #tpu.memory_space<vmem>>, vector<1x4x8x384xf32>,
    } else {
    }
    return
  }
  func.func @transform_0(%arg0: i32, %arg1: i32, %arg2: i32) -> (i32, i32, i32) {
    %c0_i32 = arith.constant 0 : i32
    %c0_i32_0 = arith.constant 0 : i32
    return %arg0, %arg2, %c0_i32 : i32, i32, i32
  }
  func.func @transform_1(%arg0: i32, %arg1: i32, %arg2: i32) -> (i32, i32, i32, i32) {
    %c0_i32 = arith.constant 0 : i32
    %c0_i32_0 = arith.constant 0 : i32
    %c0_i32_1 = arith.constant 0 : i32
    %c0_i32_2 = arith.constant 0 : i32
    return %c0_i32, %c0_i32_0, %arg1, %c0_i32_1 : i32, i32, i32, i32
  }
  func.func @transform_2(%arg0: i32, %arg1: i32, %arg2: i32) -> (i32, i32) {
    %c0_i32 = arith.constant 0 : i32
    %c0_i32_0 = arith.constant 0 : i32
    %c0_i32_1 = arith.constant 0 : i32
    return %c0_i32, %c0_i32_0 : i32, i32
  }
  func.func @transform_3(%arg0: i32, %arg1: i32, %arg2: i32) -> (i32, i32, i32, i32) {
    %c0_i32 = arith.constant 0 : i32
    %c0_i32_0 = arith.constant 0 : i32
    %c0_i32_1 = arith.constant 0 : i32
    return %arg0, %c0_i32, %arg1, %c0_i32_0 : i32, i32, i32, i32
  }
}

</mosaic_0001>

<bundles_post_ra>
// kernel: unet_up.1
= control target key start
LH: loop header
LB: loop body
LE: loop exit
PB: predicated region body
PF: predicated region fallthrough
CT: control target
= control target key end

     0   :  { %s2577_s12 = smov 0   ;;  %s2579_s13 = smov 0   ;;  %s2932_s0 = inlined_call_operand.vmem [shape: bf16[2,8,512], index: 0, kind: input, shape index: {}]   ;;  %s2933_s1 = inlined_call_operand.vmem [shape: bf16[4,4,8,8], index: 1, kind: input, shape index: {}]   ;;  %s2934_s2 = inlined_call_operand.vmem [shape: f32[1,384], index: 2, kind: input, shape index: {}]   ;;  %s2935_s3 = inlined_call_operand.vmem [shape: f32[2,4,8,384], index: 3, kind: output, shape index: {}]  }
   0x1   :  { %s2581_s14 = smov 0  }
   0x2 LB: > { %s32_s15 = sadd.s32 1, %s2540_s13  ;;  %p2155_p0 = scmp.ge.s32.totalorder %s2544_s14, 1  ;;  %s2544_s14 = sphi %s2581_s14, %s13_s14   ;;  %s2540_s13 = sphi %s2579_s13, %s2937_s13   ;;  %s2536_s12 = sphi %s2577_s12, %s2936_s12  }
   0x3   : > { %p34_p1 = scmp.ge.s32.totalorder %s32_s15, 2  ;;  %p173_p2 = scmp.lt.s32.totalorder %s2544_s14, 3 }
   0x5   : > { %s2939_s15 = smov (%p34_p1, %s32_s15), 0  ;;  %p174_p3 = pnand %p2155_p0, %p173_p2 }
   0x6   : > { %p209_p4 = scmp.lt.s32.totalorder (!%p174_p3), %s2536_s12, 1  ;;  %v2546_v0 = vmov (!%p174_p3), 0.0   ;;  %v2547_v1 = vmov (!%p174_p3), 0   ;;  %vm2548_vm0 = vmmov (!%p174_p3), 0   ;;  %s2549_s20 = smov (!%p174_p3), 127   ;;  %vm255_vm1 = vcmask (!%p174_p3), 1039360  }
   0x7   : > { %177 = sbr.rel (%p174_p3) target bundleno = 706 (0x2c2), region = 32  ;;  %2288 = vmatprep.subr.bf16.mxu1 (!%p174_p3), %v2546_v0  ;;  %305 = vmatprep.mubr.bf16.mxu0 (!%p174_p3), %v2547_v1  ;;  %s2550_s21 = smov (!%p174_p3), 110   ;;  %vm263_vm2 = vcmask (!%p174_p3), 1043456   ;;  %v2159_v17 = vld [vmem:[%s2933_s1 + $0x4] sm:$0xf] (!%p174_p3)  ;;  %vm259_vm3 = vcmask (!%p174_p3), 64512  }
   0x8   : > { %2290 = vmatprep.mubr.msk.bf16.mxu1 (!%p174_p3), %vm2548_vm0, %v2546_v0  ;;  %s2551_s22 = smov (!%p174_p3), 109   ;;  %s2552_s23 = smov (!%p174_p3), 126   ;;  %vm457_vm4 = vcmask (!%p174_p3), 900096   ;;  %v234_v28 = vld [vmem:[%s2933_s1] sm:$0xf] (!%p174_p3)  ;;  %vm567_vm5 = vcmask (!%p174_p3), 891904  }
   0x9   : > { %s2553_s24 = smov (!%p174_p3), 108   ;;  %s2554_s25 = smov (!%p174_p3), 92   ;;  %v2170_v38 = vld [vmem:[%s2933_s1 + $0x8] sm:$0xf] (!%p174_p3)  ;;  %vm699_vm6 = vcmask (!%p174_p3), 1031168   ;;  %vm979_vm7 = vcmask (!%p174_p3), 883712  }
   0xa   : > { %s2555_s26 = smov (!%p174_p3), 91   ;;  %s2556_s27 = smov (!%p174_p3), 90   ;;  %v2174_v47 = vld [vmem:[%s2933_s1 + $0xc] sm:$0xf] (!%p174_p3)  ;;  %v2179_v50 = vld [vmem:[%s2933_s1 + $0x14] sm:$0xf] (!%p174_p3) }
   0xb   : > { %v2178_v52 = vld [vmem:[%s2933_s1 + $0x10] sm:$0xf] (!%p174_p3)  ;;  %v2186_v59 = vld [vmem:[%s2933_s1 + $0x18] sm:$0xf] (!%p174_p3)  ;;  %v2190_v62 = vld [vmem:[%s2933_s1 + $0x1c] sm:$0xf] (!%p174_p3) }
   0xc   : > { %vm1281_vm8 = vcmask (!%p174_p3), 752640   ;;  %vm1391_vm9 = vcmask (!%p174_p3), 744448   ;;  %vm1782_vm10 = vcmask (!%p174_p3), 736256  }
   0xe   : > { %s2941_s12 = smov (!%p209_p4, %s2536_s12), 1 }
   0xf   : > { %s2255_s16 = sshll.u32 %s2941_s12, 4 }
  0x10   : > { %s217_s19 = scalar_lea.vmem %s2932_s0, %s2255_s16  ;;  %s2480_s16 = smul.u32 96, %s2941_s12 }
  0x11   : > { %v233_v2 = vld [vmem:[%s217_s19 + $0x8] sm:$0xff]  ;;  %v232_v3 = vld [vmem:[%s217_s19] sm:$0xff] }
  0x12   : > { %v2605_v4 = vcombine.low %v233_v2, %v233_v2  ;;  %v2160_v5 = vcombine.low %v232_v3, %v232_v3  ;;  %v2163_v6 = vcombine.high %v233_v2, %v233_v2  ;;  %v2161_v7 = vcombine.high %v232_v3, %v232_v3  ;;  %v2204_v2 = vld [vmem:[%s2933_s1 + $0x24] sm:$0xf]  ;;  %s230_s18 = scalar_lea.vmem %s2935_s3, %s2480_s16 }
  0x14   : > { %251 = vrot.lane.b32.xlu1 %v2605_v4, %s2549_s20  ;;  %247 = vrot.lane.b32.xlu0 %v2160_v5, %s2549_s20  ;;  %v358_v18 = vsel %vm263_vm2, %v2160_v5, 0  ;;  %v364_v19 = vsel %vm263_vm2, %v2605_v4, 0 }
  0x18   : > { %253 = vrot.lane.b32.xlu1 %v2163_v6, %s2549_s20  ;;  %249 = vrot.lane.b32.xlu0 %v2161_v7, %s2549_s20 }
  0x1c   : > { %449 = vrot.lane.b32.xlu0 %v2160_v5, %s2550_s21  ;;  %451 = vrot.lane.b32.xlu1 %v2161_v7, %s2550_s21 }
  0x20   : > { %453 = vrot.lane.b32.xlu0 %v2605_v4, %s2550_s21  ;;  %455 = vrot.lane.b32.xlu1 %v2163_v6, %s2550_s21 }
  0x24   : > { %559 = vrot.lane.b32.xlu0 %v2160_v5, %s2551_s22  ;;  %561 = vrot.lane.b32.xlu1 %v2161_v7, %s2551_s22 }
  0x28   : > { %563 = vrot.lane.b32.xlu0 %v2605_v4, %s2551_s22  ;;  %565 = vrot.lane.b32.xlu1 %v2163_v6, %s2551_s22 }
  0x2c   : > { %691 = vrot.lane.b32.xlu0 %v2160_v5, %s2552_s23  ;;  %693 = vrot.lane.b32.xlu1 %v2161_v7, %s2552_s23 }
  0x30   : > { %695 = vrot.lane.b32.xlu0 %v2605_v4, %s2552_s23  ;;  %697 = vrot.lane.b32.xlu1 %v2163_v6, %s2552_s23 }
  0x34   : > { %971 = vrot.lane.b32.xlu0 %v2160_v5, %s2553_s24  ;;  %973 = vrot.lane.b32.xlu1 %v2161_v7, %s2553_s24 }
  0x38   : > { %975 = vrot.lane.b32.xlu0 %v2605_v4, %s2553_s24  ;;  %977 = vrot.lane.b32.xlu1 %v2163_v6, %s2553_s24 }
  0x3c   : > { %1273 = vrot.lane.b32.xlu0 %v2160_v5, %s2554_s25  ;;  %1275 = vrot.lane.b32.xlu1 %v2161_v7, %s2554_s25 }
  0x40   : > { %1277 = vrot.lane.b32.xlu0 %v2605_v4, %s2554_s25  ;;  %1279 = vrot.lane.b32.xlu1 %v2163_v6, %s2554_s25 }
  0x44   : > { %1383 = vrot.lane.b32.xlu0 %v2160_v5, %s2555_s26  ;;  %1385 = vrot.lane.b32.xlu1 %v2161_v7, %s2555_s26 }
  0x48   : > { %1387 = vrot.lane.b32.xlu0 %v2605_v4, %s2555_s26  ;;  %1389 = vrot.lane.b32.xlu1 %v2163_v6, %s2555_s26 }
  0x4c   : > { %1774 = vrot.lane.b32.xlu0 %v2160_v5, %s2556_s27  ;;  %1776 = vrot.lane.b32.xlu1 %v2161_v7, %s2556_s27 }
  0x50   : > { %1778 = vrot.lane.b32.xlu0 %v2605_v4, %s2556_s27  ;;  %1780 = vrot.lane.b32.xlu1 %v2163_v6, %s2556_s27 }
  0x86   : > { %v252_v8 = vpop.permute.xlu1 %251  ;;  %v248_v9 = vpop.permute.xlu0 %247 }
  0x8a   : > { %v254_v10 = vpop.permute.xlu1 %253  ;;  %v250_v11 = vpop.permute.xlu0 %249 }
  0x8b   : > { %v2615_v12 = vsel %vm255_vm1, %v250_v11, %v252_v8  ;;  %v256_v13 = vsel %vm255_vm1, %v248_v9, %v250_v11  ;;  %v258_v14 = vsel %vm255_vm1, %v252_v8, %v254_v10  ;;  %v2203_v10 = vld [vmem:[%s2933_s1 + $0x20] sm:$0xf] }
  0x8c   : > { %2164 = vmatprep.subr.msk.bf16.mxu0 %vm263_vm2, %v2615_v12  ;;  %v2620_v15 = vsel %vm263_vm2, %v256_v13, 0  ;;  %v2623_v16 = vsel %vm263_vm2, %v258_v14, 0 }
  0x8d   : > { %274 = vmatpush1.bf16.msra.mxu0 %v2620_v15  ;;  %2289 = vmatpush3.bf16.msra.mxu1 %v2623_v16 }
  0x8e   : > { %2167 = vmatprep.subr.msk.bf16.mxu0 %vm263_vm2, %v2161_v7  ;;  %2294 = vmatprep.subr.bf16.mxu1 %v2546_v0  ;;  %v450_v20 = vpop.permute.xlu0 %449  ;;  %v452_v21 = vpop.permute.xlu1 %451 }
  0x8f   : > { %v458_v26 = vsel %vm457_vm4, %v450_v20, %v452_v21 }
  0x90   : > { %2165 = vmatmul.mubr.msk.bf16.vlgmr.msra.gmra.mrb[0].mxu0 %vm259_vm3, %v2159_v17  ;;  %2291 = vmatmul.mubr.msk.bf16.vlgmr.msra.gmra.mrb[0].mxu1 %vm259_vm3, %v2159_v17  ;;  %v2649_v30 = vsel %vm263_vm2, %v458_v26, 0 }
  0x91   : > { %367 = vmatpush1.bf16.msra.mxu0 %v358_v18  ;;  %2295 = vmatpush3.bf16.msra.mxu1 %v364_v19  ;;  %v2211_v19 = vld [vmem:[%s2933_s1 + $0x28] sm:$0xf] }
  0x92   : > { %v454_v22 = vpop.permute.xlu0 %453  ;;  %398 = vmatprep.mubr.bf16.mxu0 %v2547_v1  ;;  %2296 = vmatprep.mubr.msk.bf16.mxu1 %vm2548_vm0, %v2546_v0  ;;  %v456_v24 = vpop.permute.xlu1 %455 }
  0x93   : > { %v2640_v23 = vsel %vm457_vm4, %v452_v21, %v454_v22  ;;  %2300 = vmatprep.subr.bf16.mxu1 %v2546_v0  ;;  %v460_v27 = vsel %vm457_vm4, %v454_v22, %v456_v24  ;;  %v2215_v22 = vld [vmem:[%s2933_s1 + $0x2c] sm:$0xf] }
  0x94   : > { %2171 = vmatprep.subr.msk.bf16.mxu0 %vm263_vm2, %v2640_v23  ;;  %v2652_v31 = vsel %vm263_vm2, %v460_v27, 0 }
  0x96   : > { %v560_v25 = vpop.permute.xlu0 %559  ;;  %v562_v29 = vpop.permute.xlu1 %561 }
  0x97   : > { %v568_v36 = vsel %vm567_vm5, %v560_v25, %v562_v29  ;;  %v2228_v25 = vld [vmem:[%s2933_s1 + $0x30] sm:$0xf] }
  0x98   : > { %v2673_v41 = vsel %vm263_vm2, %v568_v36, 0  ;;  %v1919_v36 = vlaneseq }
  0x9a   : > { %v564_v32 = vpop.permute.xlu0 %563  ;;  %v566_v34 = vpop.permute.xlu1 %565 }
  0x9b   : > { %v2657_v33 = vsel %vm567_vm5, %v562_v29, %v564_v32  ;;  %v570_v37 = vsel %vm567_vm5, %v564_v32, %v566_v34  ;;  %v2236_v32 = vld [vmem:[%s2933_s1 + $0x38] sm:$0xf] }
  0x9c   : > { %2168 = vmatmul.mubr.msk.bf16.vlgmr.msra.gmra.mrb[0].mxu0 %vm259_vm3, %v234_v28  ;;  %2297 = vmatmul.mubr.msk.bf16.vlgmr.msra.gmra.mrb[0].mxu1 %vm259_vm3, %v234_v28  ;;  %v2676_v42 = vsel %vm263_vm2, %v570_v37, 0  ;;  %v1920_v37 = vshrl.u32 %v1919_v36, 7 }
  0x9d   : > { %474 = vmatpush1.bf16.msra.mxu0 %v2649_v30  ;;  %2301 = vmatpush3.bf16.msra.mxu1 %v2652_v31 }
  0x9e   : > { %505 = vmatprep.mubr.bf16.mxu0 %v2547_v1  ;;  %2302 = vmatprep.mubr.msk.bf16.mxu1 %vm2548_vm0, %v2546_v0  ;;  %v692_v35 = vpop.permute.xlu0 %691  ;;  %v694_v39 = vpop.permute.xlu1 %693 }
  0x9f   : > { %2175 = vmatprep.subr.msk.bf16.mxu0 %vm263_vm2, %v2657_v33  ;;  %2306 = vmatprep.subr.bf16.mxu1 %v2546_v0  ;;  %v700_v45 = vsel %vm699_vm6, %v692_v35, %v694_v39  ;;  %v2240_v35 = vld [vmem:[%s2933_s1 + $0x3c] sm:$0xf] }
  0xa0   : > { %v707_v48 = vsel %vm263_vm2, %v700_v45, 0 }
  0xa2   : > { %v696_v40 = vpop.permute.xlu0 %695  ;;  %v698_v44 = vpop.permute.xlu1 %697 }
  0xa3   : > { %v701_v43 = vsel %vm699_vm6, %v694_v39, %v696_v40  ;;  %v702_v46 = vsel %vm699_vm6, %v696_v40, %v698_v44  ;;  %v1917_v39 = vld [vmem:[%s2934_s2] sm:$0x7]  ;;  %v1925_v40 = vsub.s32 1, %v1920_v37 }
  0xa4   : > { %v713_v49 = vsel %vm263_vm2, %v702_v46, 0 }
  0xa6   : > { %v972_v51 = vpop.permute.xlu0 %971  ;;  %v974_v53 = vpop.permute.xlu1 %973 }
  0xa7   : > { %v980_v57 = vsel %vm979_vm7, %v972_v51, %v974_v53 }
  0xa8   : > { %2172 = vmatmul.mubr.msk.bf16.vlgmr.msra.gmra.mrb[0].mxu0 %vm259_vm3, %v2170_v38  ;;  %2303 = vmatmul.mubr.msk.bf16.vlgmr.msra.gmra.mrb[0].mxu1 %vm259_vm3, %v2170_v38  ;;  %v2735_v60 = vsel %vm263_vm2, %v980_v57, 0  ;;  %v1921_v38 = vsub.s32 0, %v1920_v37 }
  0xa9   : > { %584 = vmatpush1.bf16.msra.mxu0 %v2673_v41  ;;  %2307 = vmatpush3.bf16.msra.mxu1 %v2676_v42 }
  0xaa   : > { %615 = vmatprep.mubr.bf16.mxu0 %v2547_v1  ;;  %2308 = vmatprep.mubr.msk.bf16.mxu1 %vm2548_vm0, %v2546_v0  ;;  %v976_v54 = vpop.permute.xlu0 %975  ;;  %v978_v56 = vpop.permute.xlu1 %977 }
  0xab   : > { %2180 = vmatprep.subr.msk.bf16.mxu0 %vm263_vm2, %v701_v43  ;;  %2312 = vmatprep.subr.bf16.mxu1 %v2546_v0  ;;  %v2721_v55 = vsel %vm979_vm7, %v974_v53, %v976_v54  ;;  %v982_v58 = vsel %vm979_vm7, %v976_v54, %v978_v56 }
  0xac   : > { %v2738_v61 = vsel %vm263_vm2, %v982_v58, 0 }
  0xae   : > { %v1274_v63 = vpop.permute.xlu0 %1273  ;;  %v1276_v3 = vpop.permute.xlu1 %1275 }
  0xaf   : > { %v1282_v8 = vsel %vm1281_vm8, %v1274_v63, %v1276_v3 }
  0xb0   : > { %v1289_v13 = vsel %vm263_vm2, %v1282_v8, 0 }
  0xb2   : > { %v1278_v4 = vpop.permute.xlu0 %1277  ;;  %v1280_v6 = vpop.permute.xlu1 %1279 }
  0xb3   : > { %v1283_v5 = vsel %vm1281_vm8, %v1276_v3, %v1278_v4  ;;  %v1284_v9 = vsel %vm1281_vm8, %v1278_v4, %v1280_v6 }
  0xb4   : > { %2176 = vmatmul.mubr.msk.bf16.vlgmr.msra.gmra.mrb[0].mxu0 %vm259_vm3, %v2174_v47  ;;  %2309 = vmatmul.mubr.msk.bf16.vlgmr.msra.gmra.mrb[0].mxu1 %vm259_vm3, %v2174_v47  ;;  %v1295_v14 = vsel %vm263_vm2, %v1284_v9, 0 }
  0xb5   : > { %716 = vmatpush1.bf16.msra.mxu0 %v707_v48  ;;  %2313 = vmatpush3.bf16.msra.mxu1 %v713_v49 }
  0xb6   : > { %2183 = vmatprep.subr.msk.bf16.mxu0 %vm263_vm2, %v2615_v12  ;;  %747 = vmatprep.mubr.bf16.mxu0 %v2547_v1  ;;  %v1384_v7 = vpop.permute.xlu0 %1383  ;;  %v1386_v11 = vpop.permute.xlu1 %1385 }
  0xb7   : > { %2314 = vmatprep.mubr.msk.bf16.mxu1 %vm2548_vm0, %v2546_v0  ;;  %2318 = vmatprep.subr.bf16.mxu1 %v2546_v0  ;;  %v1392_v17 = vsel %vm1391_vm9, %v1384_v7, %v1386_v11 }
  0xb8   : > { %v1399_v20 = vsel %vm263_vm2, %v1392_v17, 0 }
  0xba   : > { %v1388_v12 = vpop.permute.xlu0 %1387 }
  0xbc   : > { %2181 = vmatmul.mubr.msk.bf16.vlgmr.msra.gmra.mrb[4].mxu0 %vm259_vm3, %v2179_v50  ;;  %2315 = vmatmul.mubr.msk.bf16.vlgmr.msra.gmra.mrb[4].mxu1 %vm259_vm3, %v2179_v50 }
  0xbd   : > { %800 = vmatpush1.bf16.msra.mxu0 %v2620_v15  ;;  %2319 = vmatpush3.bf16.msra.mxu1 %v2623_v16  ;;  %v1393_v15 = vsel %vm1391_vm9, %v1386_v11, %v1388_v12  ;;  %v1390_v16 = vpop.permute.xlu1 %1389 }
  0xbe   : > { %2187 = vmatprep.subr.msk.bf16.mxu0 %vm263_vm2, %v2657_v33  ;;  %831 = vmatprep.mubr.bf16.mxu0 %v2547_v1  ;;  %v1394_v18 = vsel %vm1391_vm9, %v1388_v12, %v1390_v16  ;;  %v1775_v24 = vpop.permute.xlu0 %1774 }
  0xbf   : > { %2320 = vmatprep.mubr.msk.bf16.mxu1 %vm2548_vm0, %v2546_v0  ;;  %2324 = vmatprep.subr.bf16.mxu1 %v2546_v0  ;;  %v1405_v21 = vsel %vm263_vm2, %v1394_v18, 0 }
  0xc1   : > { %v1777_v26 = vpop.permute.xlu1 %1776 }
  0xc2   : > { %v1779_v27 = vpop.permute.xlu0 %1778 }
  0xc3   : > { %v1784_v28 = vsel %vm1782_vm10, %v1777_v26, %v1779_v27 }
  0xc5   : > { %v1781_v29 = vpop.permute.xlu1 %1780 }
  0xc8   : > { %2184 = vmatmul.mubr.msk.bf16.vlgmr.msra.gmra.mrb[4].mxu0 %vm259_vm3, %v2178_v52  ;;  %2321 = vmatmul.mubr.msk.bf16.vlgmr.msra.gmra.mrb[4].mxu1 %vm259_vm3, %v2178_v52 }
  0xc9   : > { %886 = vmatpush1.bf16.msra.mxu0 %v2673_v41  ;;  %2325 = vmatpush3.bf16.msra.mxu1 %v2676_v42 }
  0xca   : > { %917 = vmatprep.mubr.bf16.mxu0 %v2547_v1  ;;  %2326 = vmatprep.mubr.msk.bf16.mxu1 %vm2548_vm0, %v2546_v0 }
  0xcb   : > { %2191 = vmatprep.subr.msk.bf16.mxu0 %vm263_vm2, %v2721_v55  ;;  %2330 = vmatprep.subr.bf16.mxu1 %v2546_v0 }
  0xd4   : > { %2188 = vmatmul.mubr.msk.bf16.vlgmr.msra.gmra.mrb[4].mxu0 %vm259_vm3, %v2186_v59  ;;  %2327 = vmatmul.mubr.msk.bf16.vlgmr.msra.gmra.mrb[4].mxu1 %vm259_vm3, %v2186_v59 }
  0xd5   : > { %996 = vmatpush1.bf16.msra.mxu0 %v2735_v60  ;;  %2331 = vmatpush3.bf16.msra.mxu1 %v2738_v61 }
  0xd6   : > { %2205 = vmatprep.subr.msk.bf16.mxu0 %vm263_vm2, %v2657_v33  ;;  %1027 = vmatprep.mubr.bf16.mxu0 %v2547_v1 }
  0xd7   : > { %2332 = vmatprep.mubr.msk.bf16.mxu1 %vm2548_vm0, %v2546_v0  ;;  %2336 = vmatprep.subr.bf16.mxu1 %v2546_v0 }
  0xe0   : > { %2192 = vmatmul.mubr.msk.bf16.vlgmr.msra.gmra.mrb[4].mxu0 %vm259_vm3, %v2190_v62  ;;  %2333 = vmatmul.mubr.msk.bf16.vlgmr.msra.gmra.mrb[4].mxu1 %vm259_vm3, %v2190_v62 }
  0xe1   : > { %1107 = vmatpush1.bf16.msra.mxu0 %v2673_v41  ;;  %2337 = vmatpush3.bf16.msra.mxu1 %v2676_v42 }
  0xe2   : > { %2208 = vmatprep.subr.msk.bf16.mxu0 %vm263_vm2, %v2640_v23  ;;  %1138 = vmatprep.mubr.bf16.mxu0 %v2547_v1  ;;  %v2229_v23 = vld [vmem:[%s2933_s1 + $0x34] sm:$0xf] }
  0xe3   : > { %2338 = vmatprep.mubr.msk.bf16.mxu1 %vm2548_vm0, %v2546_v0  ;;  %2342 = vmatprep.subr.bf16.mxu1 %v2546_v0 }
  0xe8   : > { %2206 = vmatmul.mubr.msk.bf16.vlgmr.msra.gmra.mrb[8].mxu0 %vm259_vm3, %v2204_v2  ;;  %2339 = vmatmul.mubr.msk.bf16.vlgmr.msra.gmra.mrb[8].mxu1 %vm259_vm3, %v2204_v2 }
  0xe9   : > { %1191 = vmatpush1.bf16.msra.mxu0 %v2649_v30  ;;  %2343 = vmatpush3.bf16.msra.mxu1 %v2652_v31  ;;  %v1783_v30 = vsel %vm1782_vm10, %v1775_v24, %v1777_v26  ;;  %v1785_v31 = vsel %vm1782_vm10, %v1779_v27, %v1781_v29 }
  0xea   : > { %1222 = vmatprep.mubr.bf16.mxu0 %v2547_v1  ;;  %2344 = vmatprep.mubr.msk.bf16.mxu1 %vm2548_vm0, %v2546_v0  ;;  %v1796_v34 = vsel %vm263_vm2, %v1785_v31, 0 }
  0xeb   : > { %2212 = vmatprep.subr.msk.bf16.mxu0 %vm263_vm2, %v1283_v5  ;;  %2348 = vmatprep.subr.bf16.mxu1 %v2546_v0 }
  0xf4   : > { %2209 = vmatmul.mubr.msk.bf16.vlgmr.msra.gmra.mrb[8].mxu0 %vm259_vm3, %v2203_v10  ;;  %2345 = vmatmul.mubr.msk.bf16.vlgmr.msra.gmra.mrb[8].mxu1 %vm259_vm3, %v2203_v10 }
  0xf5   : > { %1298 = vmatpush1.bf16.msra.mxu0 %v1289_v13  ;;  %2349 = vmatpush3.bf16.msra.mxu1 %v1295_v14 }
  0xf6   : > { %1329 = vmatprep.mubr.bf16.mxu0 %v2547_v1  ;;  %2350 = vmatprep.mubr.msk.bf16.mxu1 %vm2548_vm0, %v2546_v0 }
  0xf7   : > { %2216 = vmatprep.subr.msk.bf16.mxu0 %vm263_vm2, %v1393_v15  ;;  %2354 = vmatprep.subr.bf16.mxu1 %v2546_v0 }
 0x100   : > { %2213 = vmatmul.mubr.msk.bf16.vlgmr.msra.gmra.mrb[8].mxu0 %vm259_vm3, %v2211_v19  ;;  %2351 = vmatmul.mubr.msk.bf16.vlgmr.msra.gmra.mrb[8].mxu1 %vm259_vm3, %v2211_v19 }
 0x101   : > { %1408 = vmatpush1.bf16.msra.mxu0 %v1399_v20  ;;  %2355 = vmatpush3.bf16.msra.mxu1 %v1405_v21 }
 0x102   : > { %2230 = vmatprep.subr.msk.bf16.mxu0 %vm263_vm2, %v2721_v55  ;;  %1439 = vmatprep.mubr.bf16.mxu0 %v2547_v1 }
 0x103   : > { %2356 = vmatprep.mubr.msk.bf16.mxu1 %vm2548_vm0, %v2546_v0  ;;  %2360 = vmatprep.subr.bf16.mxu1 %v2546_v0 }
 0x10c   : > { %2217 = vmatmul.mubr.msk.bf16.vlgmr.msra.gmra.mrb[8].mxu0 %vm259_vm3, %v2215_v22  ;;  %2357 = vmatmul.mubr.msk.bf16.vlgmr.msra.gmra.mrb[8].mxu1 %vm259_vm3, %v2215_v22 }
 0x10d   : > { %1519 = vmatpush1.bf16.msra.mxu0 %v2735_v60  ;;  %2361 = vmatpush3.bf16.msra.mxu1 %v2738_v61 }
 0x10e   : > { %2233 = vmatprep.subr.msk.bf16.mxu0 %vm263_vm2, %v2657_v33  ;;  %1550 = vmatprep.mubr.bf16.mxu0 %v2547_v1  ;;  %v1790_v33 = vsel %vm263_vm2, %v1783_v30, 0 }
 0x10f   : > { %2362 = vmatprep.mubr.msk.bf16.mxu1 %vm2548_vm0, %v2546_v0  ;;  %2366 = vmatprep.subr.bf16.mxu1 %v2546_v0 }
 0x114   : > { %2231 = vmatmul.mubr.msk.bf16.vlgmr.msra.gmra.mrb[12].mxu0 %vm259_vm3, %v2229_v23  ;;  %2363 = vmatmul.mubr.msk.bf16.vlgmr.msra.gmra.mrb[12].mxu1 %vm259_vm3, %v2229_v23 }
 0x115   : > { %1603 = vmatpush1.bf16.msra.mxu0 %v2673_v41  ;;  %2367 = vmatpush3.bf16.msra.mxu1 %v2676_v42  ;;  %v2856_v41 = vrot.slane %v1917_v39, %v1921_v38 }
 0x116   : > { %2237 = vmatprep.subr.msk.bf16.mxu0 %vm263_vm2, %v1393_v15  ;;  %1634 = vmatprep.mubr.bf16.mxu0 %v2547_v1 }
 0x117   : > { %2368 = vmatprep.mubr.msk.bf16.mxu1 %vm2548_vm0, %v2546_v0  ;;  %2372 = vmatprep.subr.bf16.mxu1 %v2546_v0 }
 0x120   : > { %2234 = vmatmul.mubr.msk.bf16.vlgmr.msra.gmra.mrb[12].mxu0 %vm259_vm3, %v2228_v25  ;;  %2369 = vmatmul.mubr.msk.bf16.vlgmr.msra.gmra.mrb[12].mxu1 %vm259_vm3, %v2228_v25 }
 0x121   : > { %1689 = vmatpush1.bf16.msra.mxu0 %v1399_v20  ;;  %2373 = vmatpush3.bf16.msra.mxu1 %v1405_v21 }
 0x122   : > { %1720 = vmatprep.mubr.bf16.mxu0 %v2547_v1  ;;  %2374 = vmatprep.mubr.msk.bf16.mxu1 %vm2548_vm0, %v2546_v0 }
 0x123   : > { %2241 = vmatprep.subr.msk.bf16.mxu0 %vm263_vm2, %v1784_v28  ;;  %2378 = vmatprep.subr.bf16.mxu1 %v2546_v0 }
 0x12c   : > { %2238 = vmatmul.mubr.msk.bf16.vlgmr.msra.gmra.mrb[12].mxu0 %vm259_vm3, %v2236_v32  ;;  %2375 = vmatmul.mubr.msk.bf16.vlgmr.msra.gmra.mrb[12].mxu1 %vm259_vm3, %v2236_v32 }
 0x12d   : > { %1799 = vmatpush1.bf16.msra.mxu0 %v1790_v33  ;;  %2379 = vmatpush3.bf16.msra.mxu1 %v1796_v34 }
 0x12e   : > { %1830 = vmatprep.mubr.bf16.mxu0 %v2547_v1  ;;  %2380 = vmatprep.mubr.msk.bf16.mxu1 %vm2548_vm0, %v2546_v0  ;;  %v1929_v1 = vsub.s32 2, %v1920_v37  ;;  %v2858_v0 = vrot.slane %v1917_v39, %v1925_v40 }
 0x130   : > { %v2860_v42 = vrot.slane %v1917_v39, %v1929_v1 }
 0x138   : > { %2242 = vmatmul.mubr.msk.bf16.vlgmr.msra.gmra.mrb[12].mxu0 %vm259_vm3, %v2240_v35  ;;  %2381 = vmatmul.mubr.msk.bf16.vlgmr.msra.gmra.mrb[12].mxu1 %vm259_vm3, %v2240_v35 }
 0x187   : > { %v2862_v43 = vpop.f32.mrb[0].mxu0  ;;  %v2864_v44 = vpop.f32.mrb[0].mxu1 }
 0x188   : > { %v2866_v45 = vpop.f32.mrb[1].mxu0  ;;  %v2310_v46 = vpop.f32.mrb[1].mxu1  ;;  %v1934_v47 = vmul.f32 %v2856_v41, %v2862_v43  ;;  %v1936_v51 = vmul.f32 %v2860_v42, %v2864_v44 }
 0x189   : > { %v621_v48 = vpop.f32.mrb[2].mxu0  ;;  %v661_v49 = vpop.f32.mrb[2].mxu1  ;;  %v1935_v50 = vmul.f32 %v2858_v0, %v2866_v45 }
 0x18a   : > { %v622_v52 = vpop.f32.mrb[3].mxu0  ;;  %v2311_v53 = vpop.f32.mrb[3].mxu1  ;;  %v1959_v54 = vmul.f32 %v1934_v47, %v2862_v43  ;;  %v1961_v58 = vmul.f32 %v1936_v51, %v2864_v44 }
 0x18b   : > { %v1946_v55 = vadd.f32 %v1935_v50, %v1934_v47  ;;  %v1960_v56 = vmul.f32 %v1935_v50, %v2866_v45 }
 0x18d   : > { %v1947_v57 = vadd.f32 %v1946_v55, %v1936_v51  ;;  %v1971_v59 = vadd.f32 %v1960_v56, %v1959_v54 }
 0x18f   : > { %v1972_v60 = vadd.f32 %v1971_v59, %v1961_v58 }
 0x1b3   : > { %v2877_v61 = vpop.f32.mrb[4].mxu0  ;;  %v2879_v62 = vpop.f32.mrb[4].mxu1 }
 0x1b4   : > { %v2881_v63 = vpop.f32.mrb[5].mxu0  ;;  %v2334_v2 = vpop.f32.mrb[5].mxu1  ;;  %v1937_v3 = vmul.f32 %v2856_v41, %v2877_v61  ;;  %v1939_v9 = vmul.f32 %v2860_v42, %v2879_v62 }
 0x1b5   : > { %v1033_v4 = vpop.f32.mrb[6].mxu0  ;;  %v1073_v5 = vpop.f32.mrb[6].mxu1  ;;  %v1938_v6 = vmul.f32 %v2858_v0, %v2881_v63 }
 0x1b6   : > { %v1034_v7 = vpop.f32.mrb[7].mxu0  ;;  %v2335_v8 = vpop.f32.mrb[7].mxu1  ;;  %v1948_v10 = vadd.f32 %v1947_v57, %v1937_v3  ;;  %v1962_v11 = vmul.f32 %v1937_v3, %v2877_v61  ;;  %v1964_v16 = vmul.f32 %v1939_v9, %v2879_v62 }
 0x1b7   : > { %v1963_v12 = vmul.f32 %v1938_v6, %v2881_v63 }
 0x1b8   : > { %v1949_v13 = vadd.f32 %v1948_v10, %v1938_v6  ;;  %v1973_v14 = vadd.f32 %v1972_v60, %v1962_v11 }
 0x1ba   : > { %v1950_v15 = vadd.f32 %v1949_v13, %v1939_v9  ;;  %v1974_v17 = vadd.f32 %v1973_v14, %v1963_v12 }
 0x1bc   : > { %v1975_v18 = vadd.f32 %v1974_v17, %v1964_v16 }
 0x1df   : > { %v2892_v19 = vpop.f32.mrb[8].mxu0  ;;  %v2894_v20 = vpop.f32.mrb[8].mxu1 }
 0x1e0   : > { %v2896_v21 = vpop.f32.mrb[9].mxu0  ;;  %v2358_v22 = vpop.f32.mrb[9].mxu1  ;;  %v1940_v23 = vmul.f32 %v2856_v41, %v2892_v19  ;;  %v1942_v29 = vmul.f32 %v2860_v42, %v2894_v20 }
 0x1e1   : > { %v1445_v24 = vpop.f32.mrb[10].mxu0  ;;  %v1485_v25 = vpop.f32.mrb[10].mxu1  ;;  %v1941_v26 = vmul.f32 %v2858_v0, %v2896_v21 }
 0x1e2   : > { %v1446_v27 = vpop.f32.mrb[11].mxu0  ;;  %v2359_v28 = vpop.f32.mrb[11].mxu1  ;;  %v1951_v30 = vadd.f32 %v1950_v15, %v1940_v23  ;;  %v1965_v31 = vmul.f32 %v1940_v23, %v2892_v19  ;;  %v1967_v36 = vmul.f32 %v1942_v29, %v2894_v20 }
 0x1e3   : > { %v1966_v32 = vmul.f32 %v1941_v26, %v2896_v21 }
 0x1e4   : > { %v1952_v33 = vadd.f32 %v1951_v30, %v1941_v26  ;;  %v1976_v34 = vadd.f32 %v1975_v18, %v1965_v31 }
 0x1e6   : > { %v1953_v35 = vadd.f32 %v1952_v33, %v1942_v29  ;;  %v1977_v37 = vadd.f32 %v1976_v34, %v1966_v32 }
 0x1e8   : > { %v1978_v38 = vadd.f32 %v1977_v37, %v1967_v36 }
 0x20b   : > { %v1832_v39 = vpop.f32.mrb[12].mxu0  ;;  %v1873_v40 = vpop.f32.mrb[12].mxu1 }
 0x20c   : > { %v1834_v1 = vpop.f32.mrb[13].mxu0  ;;  %v2382_v46 = vpop.f32.mrb[13].mxu1  ;;  %v1943_v47 = vmul.f32 %v2856_v41, %v1832_v39  ;;  %v1945_v53 = vmul.f32 %v2860_v42, %v1873_v40 }
 0x20d   : > { %v1836_v48 = vpop.f32.mrb[14].mxu0  ;;  %v1876_v49 = vpop.f32.mrb[14].mxu1  ;;  %v1944_v50 = vmul.f32 %v2858_v0, %v1834_v1 }
 0x20e   : > { %v1837_v51 = vpop.f32.mrb[15].mxu0  ;;  %v2383_v52 = vpop.f32.mrb[15].mxu1  ;;  %v1954_v54 = vadd.f32 %v1953_v35, %v1943_v47  ;;  %v1968_v55 = vmul.f32 %v1943_v47, %v1832_v39  ;;  %v1970_v60 = vmul.f32 %v1945_v53, %v1873_v40 }
 0x20f   : > { %v1969_v56 = vmul.f32 %v1944_v50, %v1834_v1 }
 0x210   : > { %v1955_v57 = vadd.f32 %v1954_v54, %v1944_v50  ;;  %v1979_v58 = vadd.f32 %v1978_v38, %v1968_v55 }
 0x212   : > { %v1956_v59 = vadd.f32 %v1955_v57, %v1945_v53  ;;  %v1980_v2 = vadd.f32 %v1979_v58, %v1969_v56 }
 0x214   : > { %1957 = vadd.xlane.f32.xlu0 %v1956_v59  ;;  %v1981_v3 = vadd.f32 %v1980_v2, %v1970_v60 }
 0x216   : > { %1982 = vadd.xlane.f32.xlu1 %v1981_v3 }
 0x2a1   : > { %v1958_v41 = vpop.xlane.xlu0 %1957 }
 0x2a2   : > { %v1984_v4 = vmul.f32 0.0009765625, %v1958_v41 }
 0x2a3   : > { %v1983_v5 = vpop.xlane.xlu1 %1982 }
 0x2a4   : > { %v1985_v0 = vmul.f32 0.0009765625, %v1983_v5  ;;  %v1986_v6 = vmul.f32 %v1984_v4, %v1984_v4  ;;  %v1991_v9 = vsub.f32 %v2862_v43, %v1984_v4  ;;  %v1992_v10 = vsub.f32 %v2866_v45, %v1984_v4 }
 0x2a5   : > { %v1993_v11 = vsub.f32 %v2864_v44, %v1984_v4  ;;  %v1994_v12 = vsub.f32 %v2877_v61, %v1984_v4  ;;  %v1995_v13 = vsub.f32 %v2881_v63, %v1984_v4  ;;  %v1996_v14 = vsub.f32 %v2879_v62, %v1984_v4 }
 0x2a6   : > { %v1987_v7 = vsub.f32 %v1985_v0, %v1986_v6  ;;  %v1997_v15 = vsub.f32 %v2892_v19, %v1984_v4  ;;  %v1998_v16 = vsub.f32 %v2896_v21, %v1984_v4  ;;  %v1999_v18 = vsub.f32 %v2894_v20, %v1984_v4 }
 0x2a7   : > { %v2000_v22 = vsub.f32 %v1832_v39, %v1984_v4  ;;  %v2001_v43 = vsub.f32 %v1834_v1, %v1984_v4  ;;  %v2002_v23 = vsub.f32 %v1873_v40, %v1984_v4 }
 0x2a8   : > { %v1988_v8 = vmax.f32 %v1987_v7, 0.0 }
 0x2aa   : > { %v1989_v42 = vadd.f32 1e-05, %v1988_v8 }
 0x2ac   : > { %2520 = vrsqrt.f32 %v1989_v42 }
 0x2b6   : > { %v2521_v17 = vpop.eup %2520 }
 0x2b7   : > { %v2003_v45 = vmul.f32 %v2521_v17, %v1991_v9  ;;  %v2004_v24 = vmul.f32 %v2521_v17, %v1992_v10  ;;  %v2005_v44 = vmul.f32 %v2521_v17, %v1993_v11  ;;  %v2006_v25 = vmul.f32 %v2521_v17, %v1994_v12 }
 0x2b8   : > { %v2007_v61 = vmul.f32 %v2521_v17, %v1995_v13  ;;  %v2008_v26 = vmul.f32 %v2521_v17, %v1996_v14  ;;  %v2009_v27 = vmul.f32 %v2521_v17, %v1997_v15  ;;  %v2010_v63 = vmul.f32 %v2521_v17, %v1998_v16 }
 0x2b9   : > { %v2011_v62 = vmul.f32 %v2521_v17, %v1999_v18  ;;  %v2012_v19 = vmul.f32 %v2521_v17, %v2000_v22  ;;  %v2013_v21 = vmul.f32 %v2521_v17, %v2001_v43  ;;  %v2014_v28 = vmul.f32 %v2521_v17, %v2002_v23 }
 0x2ba   : > { %v2015_v20 = vmax.f32 %v2003_v45, 0.0  ;;  %v2016_v29 = vmax.f32 %v2004_v24, 0.0  ;;  %v2017_v30 = vmax.f32 %v2005_v44, 0.0  ;;  %v2018_v31 = vmax.f32 %v2006_v25, 0.0 }
 0x2bb   : > { %v2019_v32 = vmax.f32 %v2007_v61, 0.0  ;;  %v2020_v33 = vmax.f32 %v2008_v26, 0.0  ;;  %v2021_v34 = vmax.f32 %v2009_v27, 0.0  ;;  %v2022_v35 = vmax.f32 %v2010_v63, 0.0 }
 0x2bc   : > { %v2023_v36 = vmax.f32 %v2011_v62, 0.0  ;;  %v2024_v37 = vmax.f32 %v2012_v19, 0.0  ;;  %v2025_v38 = vmax.f32 %v2013_v21, 0.0  ;;  %v2026_v39 = vmax.f32 %v2014_v28, 0.0  ;;  %2027 = vst [vmem:[%s230_s18] sm:$0xff] %v2015_v20  ;;  %2028 = vst [vmem:[%s230_s18 + $0x8] sm:$0xff] %v2016_v29 }
 0x2bd   : > { %2029 = vst [vmem:[%s230_s18 + $0x10] sm:$0xff] %v2017_v30  ;;  %2030 = vst [vmem:[%s230_s18 + $0x18] sm:$0xff] %v2018_v31 }
 0x2be   : > { %2031 = vst [vmem:[%s230_s18 + $0x20] sm:$0xff] %v2019_v32  ;;  %2032 = vst [vmem:[%s230_s18 + $0x28] sm:$0xff] %v2020_v33 }
 0x2bf   : > { %2033 = vst [vmem:[%s230_s18 + $0x30] sm:$0xff] %v2021_v34  ;;  %2034 = vst [vmem:[%s230_s18 + $0x38] sm:$0xff] %v2022_v35 }
 0x2c0   : > { %2035 = vst [vmem:[%s230_s18 + $0x40] sm:$0xff] %v2023_v36  ;;  %2036 = vst [vmem:[%s230_s18 + $0x48] sm:$0xff] %v2024_v37 }
 0x2c1   : > { %2037 = vst [vmem:[%s230_s18 + $0x50] sm:$0xff] %v2025_v38  ;;  %2038 = vst [vmem:[%s230_s18 + $0x58] sm:$0xff] %v2026_v39 }
 0x2c2 PF: > { %s13_s14 = sadd.s32 1, %s2544_s14   ;;  %s2936_s12 = smov %s2540_s13 }
 0x2c3   : > { %p10_p5 = scmp.ge.s32.totalorder %s13_s14, 4   ;;  %s2937_s13 = smov %s2939_s15 }
 0x2c5   :  { %12 = sbr.rel (!%p10_p5) target bundleno = 2 (0x2), region = 122 }

</bundles_post_ra>
